<compile_context>
chip_gen: v7x
topology: tpu7x:2x2x1
jax: 0.10.0
libtpu: 0.0.40
codegen_flags: <defaults>
</compile_context>

<pallas_src>
import jax
import jax.numpy as jnp
from jax import lax
from jax.experimental import pallas as pl
from jax.experimental.pallas import tpu as pltpu


def _linear_lora_kernel(x_ref, w_ref, b_ref, a_ref, bs_ref, o_ref,
                        acc_ref, xa_ref):
    k = pl.program_id(2)

    @pl.when(k == 0)
    def _():
        acc_ref[...] = jnp.zeros_like(acc_ref)
        xa_ref[...] = jnp.zeros_like(xa_ref)

    x = x_ref[...]                                   # (tm, tk)

    # Base path: x (tm, tk) contracted with W (tn, tk) along dim 1 of both
    # -> (tm, tn).  No transpose materialized; the MXU handles either
    # operand orientation.
    acc_ref[...] += lax.dot_general(
        x, w_ref[...],
        dimension_numbers=(((1,), (1,)), ((), ())),
        preferred_element_type=jnp.float32)

    # LoRA down-projection, accumulated across K tiles: (tm, tk) @ (tk, r).
    xa_ref[...] += jnp.dot(x, a_ref[...], preferred_element_type=jnp.float32)

    @pl.when(k == pl.num_programs(2) - 1)
    def _():
        out = acc_ref[...] + b_ref[...]              # bias broadcast (1, tn)
        # Rank-r epilogue: (tm, r) @ (r, tn), alpha already folded into B.
        out = out + jnp.dot(xa_ref[...], bs_ref[...],
                            preferred_element_type=jnp.float32)
        o_ref[...] = out.astype(o_ref.dtype)


def _pick_tile(dim, pref, align):
    """Largest tile <= pref that divides dim and is a multiple of `align`
    (or the full dim, which is always a legal block extent)."""
    if dim <= pref:
        return dim
    t = (pref // align) * align
    while t > 0:
        if dim % t == 0:
            return t
        t -= align
    return dim


def linear_with_lora(x, W, bias, A, B, alpha, *,
                     tm=256, tn=256, tk=512, vmem_limit_bytes=None):
    """x: [M, in], W: [out, in] (PyTorch nn.Linear layout), bias: [out],
    A: [in, r], B: [r, out], alpha: scalar.  Returns [M, out]."""
    M, in_dim = x.shape
    out_dim = W.shape[0]
    r = A.shape[1]

    # Tile sizes: sublane dims need 8-alignment, lane dims need 128-alignment
    # (unless the block covers the full dimension).
    tm = _pick_tile(M, tm, 8)
    tn = _pick_tile(out_dim, tn, 128)
    tk = _pick_tile(in_dim, tk, 128)

    b2 = bias.reshape(1, out_dim)
    b_scaled = jnp.asarray(alpha, B.dtype) * B       # fold alpha into B (O(r*out))

    grid = (M // tm, out_dim // tn, in_dim // tk)

    # NOTE: for best HBM utilization on real workloads, pass x / W / A / B in
    # bf16 (f32 accumulation is kept inside the kernel either way).
    return pl.pallas_call(
        _linear_lora_kernel,
        out_shape=jax.ShapeDtypeStruct((M, out_dim), x.dtype),
        grid_spec=pltpu.PrefetchScalarGridSpec(
            num_scalar_prefetch=0,
            grid=grid,
            in_specs=[
                pl.BlockSpec((tm, tk), lambda i, j, k: (i, k)),   # x
                pl.BlockSpec((tn, tk), lambda i, j, k: (j, k)),   # W [out, in]
                pl.BlockSpec((1, tn), lambda i, j, k: (0, j)),    # bias
                pl.BlockSpec((tk, r), lambda i, j, k: (k, 0)),    # A
                pl.BlockSpec((r, tn), lambda i, j, k: (0, j)),    # alpha*B
            ],
            out_specs=pl.BlockSpec((tm, tn), lambda i, j, k: (i, j)),
            scratch_shapes=[
                pltpu.VMEM((tm, tn), jnp.float32),   # base-path f32 accumulator
                pltpu.VMEM((tm, r), jnp.float32),    # xa = x @ A accumulator
            ],
        ),
        compiler_params=pltpu.CompilerParams(
            dimension_semantics=("parallel", "parallel", "arbitrary"),
            vmem_limit_bytes=vmem_limit_bytes,
        ),
    )(x, W, b2, A, b_scaled)


if __name__ == "__main__":
    # Small shapes consistent with nn.Linear(in_features=256, out_features=256),
    # rank=4.  Tile overrides chosen so the demo exercises a real 2x2x2 grid
    # (k==0 init / k==last finalize paths).
    batch, in_dim, out_dim, rank = 128, 256, 256, 4
    alpha = 2.0

    key = jax.random.PRNGKey(0)
    kx, kw, kb, ka, kbb = jax.random.split(key, 5)

    x = jax.random.normal(kx, (batch, in_dim), dtype=jnp.float32)
    # nn.Linear params (deterministic synthetic init), PyTorch [out, in] layout.
    W = jax.random.normal(kw, (out_dim, in_dim), dtype=jnp.float32) * 0.1
    bias = jax.random.normal(kb, (out_dim,), dtype=jnp.float32) * 0.1
    # LoRALayer params: A ~ randn / sqrt(rank); B nonzero here so the LoRA
    # path is actually exercised (module inits B=0, but it trains to nonzero).
    A = jax.random.normal(ka, (in_dim, rank), dtype=jnp.float32) / jnp.sqrt(
        jnp.float32(rank))
    B = jax.random.normal(kbb, (rank, out_dim), dtype=jnp.float32) * 0.05

    out = linear_with_lora(x, W, bias, A, B, alpha, tm=64, tn=128, tk=128)
    out = jax.block_until_ready(out)

    # reference in plain JAX
    ref = x @ W.T + bias + alpha * ((x @ A) @ B)
    assert out.shape == (batch, out_dim)
    assert jnp.allclose(out, ref, atol=1e-4, rtol=1e-4)

    # TODO(synk): the pissa SVD re-initialization (devide_matrix_by_svd*) is a
    # one-time host-side parameter transform, not part of the forward pass, so
    # it is intentionally not implemented as a kernel.

    print("KERNEL_OK")
</pallas_src>

<mosaic_0001>
module attributes {stable_mosaic.version = 11 : i64} {
  func.func @_linear_lora_kernel(%arg0: i32, %arg1: i32, %arg2: i32, %arg3: memref<64x128xf32, #tpu.memory_space<vmem>>, %arg4: memref<128x128xf32, #tpu.memory_space<vmem>>, %arg5: memref<1x128xf32, #tpu.memory_space<vmem>>, %arg6: memref<128x4xf32, #tpu.memory_space<vmem>>, %arg7: memref<4x128xf32, #tpu.memory_space<vmem>>, %arg8: memref<64x128xf32, #tpu.memory_space<vmem>>, %arg9: memref<64x128xf32, #tpu.memory_space<vmem>>, %arg10: memref<64x4xf32, #tpu.memory_space<vmem>>) attributes {dimension_semantics = [#tpu.dimension_semantics<parallel>, #tpu.dimension_semantics<parallel>, #tpu.dimension_semantics<arbitrary>], iteration_bounds = array<i64: 2, 2, 2>, scalar_prefetch = 0 : i64, scratch_operands = 2 : i64, tpu.core_type = #tpu.core_type<tc>, window_params = [{transform_indices = @transform_0, window_bounds = array<i64: 64, 128>}, {transform_indices = @transform_1, window_bounds = array<i64: 128, 128>}, {transform_indices = @transform_2, window_bounds = array<i64: 1, 128>}, {transform_indices = @transform_3, window_bounds = array<i64: 128, 4>}, {transform_indices = @transform_4, window_bounds = array<i64: 4, 128>}, {transform_indices = @transform_5, window_bounds = array<i64: 64, 128>}]} {
    %c0_i32 = arith.constant 0 : i32
    %0 = arith.cmpi eq, %arg2, %c0_i32 : i32
    %1 = arith.extui %0 : i1 to i32
    %c0_i32_0 = arith.constant 0 : i32
    %2 = arith.cmpi ne, %1, %c0_i32_0 : i32
    scf.if %2 {
      %cst_16 = arith.constant 0.000000e+00 : f32
      %17 = vector.broadcast %cst_16 : f32 to vector<64x128xf32>
      %c0_17 = arith.constant 0 : index
      %c0_18 = arith.constant 0 : index
      %18 = vector.load %arg9[%c0_17, %c0_18] : memref<64x128xf32, #tpu.memory_space<vmem>>, vector<64x128xf32>
      tpu.vector_store %arg9[%c0_17, %c0_18], %17 {strides = array<i32>} : memref<64x128xf32, #tpu.memory_space<vmem>>, vector<64x128xf32>,
      %cst_19 = arith.constant 0.000000e+00 : f32
      %19 = vector.broadcast %cst_19 : f32 to vector<64x4xf32>
      %c0_20 = arith.constant 0 : index
      %c0_21 = arith.constant 0 : index
      %20 = vector.load %arg10[%c0_20, %c0_21] : memref<64x4xf32, #tpu.memory_space<vmem>>, vector<64x4xf32>
      tpu.vector_store %arg10[%c0_20, %c0_21], %19 {strides = array<i32>} : memref<64x4xf32, #tpu.memory_space<vmem>>, vector<64x4xf32>,
    } else {
    }
    %c0 = arith.constant 0 : index
    %c0_1 = arith.constant 0 : index
    %3 = vector.load %arg3[%c0, %c0_1] : memref<64x128xf32, #tpu.memory_space<vmem>>, vector<64x128xf32>
    %c0_2 = arith.constant 0 : index
    %c0_3 = arith.constant 0 : index
    %4 = vector.load %arg9[%c0_2, %c0_3] : memref<64x128xf32, #tpu.memory_space<vmem>>, vector<64x128xf32>
    %c0_4 = arith.constant 0 : index
    %c0_5 = arith.constant 0 : index
    %5 = vector.load %arg4[%c0_4, %c0_5] : memref<128x128xf32, #tpu.memory_space<vmem>>, vector<128x128xf32>
    %cst = arith.constant dense<0.000000e+00> : vector<64x128xf32>
    %6 = tpu.matmul %3, %5, %cst {dimension_numbers = #tpu.dot_dimension_numbers<[1], [1], [0], [0], [0, 0, 1, 0], [], []>} : vector<64x128xf32>, vector<128x128xf32>, vector<64x128xf32> -> vector<64x128xf32>
    %7 = arith.addf %4, %6 : vector<64x128xf32>
    %c0_6 = arith.constant 0 : index
    %c0_7 = arith.constant 0 : index
    %8 = vector.load %arg9[%c0_6, %c0_7] : memref<64x128xf32, #tpu.memory_space<vmem>>, vector<64x128xf32>
    tpu.vector_store %arg9[%c0_6, %c0_7], %7 {strides = array<i32>} : memref<64x128xf32, #tpu.memory_space<vmem>>, vector<64x128xf32>,
    %c0_8 = arith.constant 0 : index
    %c0_9 = arith.constant 0 : index
    %9 = vector.load %arg10[%c0_8, %c0_9] : memref<64x4xf32, #tpu.memory_space<vmem>>, vector<64x4xf32>
    %c0_10 = arith.constant 0 : index
    %c0_11 = arith.constant 0 : index
    %10 = vector.load %arg6[%c0_10, %c0_11] : memref<128x4xf32, #tpu.memory_space<vmem>>, vector<128x4xf32>
    %cst_12 = arith.constant dense<0.000000e+00> : vector<64x4xf32>
    %11 = tpu.matmul %3, %10, %cst_12 {dimension_numbers = #tpu.dot_dimension_numbers<[1], [0], [0], [1], [0, 0, 1, 1], [], []>} : vector<64x128xf32>, vector<128x4xf32>, vector<64x4xf32> -> vector<64x4xf32>
    %12 = arith.addf %9, %11 : vector<64x4xf32>
    %c0_13 = arith.constant 0 : index
    %c0_14 = arith.constant 0 : index
    %13 = vector.load %arg10[%c0_13, %c0_14] : memref<64x4xf32, #tpu.memory_space<vmem>>, vector<64x4xf32>
    tpu.vector_store %arg10[%c0_13, %c0_14], %12 {strides = array<i32>} : memref<64x4xf32, #tpu.memory_space<vmem>>, vector<64x4xf32>,
    %c1_i32 = arith.constant 1 : i32
    %14 = arith.cmpi eq, %arg2, %c1_i32 : i32
    %15 = arith.extui %14 : i1 to i32
    %c0_i32_15 = arith.constant 0 : i32
    %16 = arith.cmpi ne, %15, %c0_i32_15 : i32
    scf.if %16 {
      %c0_16 = arith.constant 0 : index
      %c0_17 = arith.constant 0 : index
      %17 = vector.load %arg9[%c0_16, %c0_17] : memref<64x128xf32, #tpu.memory_space<vmem>>, vector<64x128xf32>
      %c0_18 = arith.constant 0 : index
      %c0_19 = arith.constant 0 : index
      %18 = vector.load %arg5[%c0_18, %c0_19] : memref<1x128xf32, #tpu.memory_space<vmem>>, vector<1x128xf32>
      %19 = vector.broadcast %18 : vector<1x128xf32> to vector<64x128xf32>
      %20 = arith.addf %17, %19 : vector<64x128xf32>
      %c0_20 = arith.constant 0 : index
      %c0_21 = arith.constant 0 : index
      %21 = vector.load %arg10[%c0_20, %c0_21] : memref<64x4xf32, #tpu.memory_space<vmem>>, vector<64x4xf32>
      %c0_22 = arith.constant 0 : index
      %c0_23 = arith.constant 0 : index
      %22 = vector.load %arg7[%c0_22, %c0_23] : memref<4x128xf32, #tpu.memory_space<vmem>>, vector<4x128xf32>
      %cst_24 = arith.constant dense<0.000000e+00> : vector<64x128xf32>
      %23 = tpu.matmul %21, %22, %cst_24 {dimension_numbers = #tpu.dot_dimension_numbers<[1], [0], [0], [1], [0, 0, 1, 1], [], []>} : vector<64x4xf32>, vector<4x128xf32>, vector<64x128xf32> -> vector<64x128xf32>
      %24 = arith.addf %20, %23 : vector<64x128xf32>
      %c0_25 = arith.constant 0 : index
      %c0_26 = arith.constant 0 : index
      %25 = vector.load %arg8[%c0_25, %c0_26] : memref<64x128xf32, #tpu.memory_space<vmem>>, vector<64x128xf32>
      tpu.vector_store %arg8[%c0_25, %c0_26], %24 {strides = array<i32>} : memref<64x128xf32, #tpu.memory_space<vmem>>, vector<64x128xf32>,
    } else {
    }
    return
  }
  func.func @transform_0(%arg0: i32, %arg1: i32, %arg2: i32) -> (i32, i32) {
    %c0_i32 = arith.constant 0 : i32
    return %arg0, %arg2 : i32, i32
  }
  func.func @transform_1(%arg0: i32, %arg1: i32, %arg2: i32) -> (i32, i32) {
    %c0_i32 = arith.constant 0 : i32
    return %arg1, %arg2 : i32, i32
  }
  func.func @transform_2(%arg0: i32, %arg1: i32, %arg2: i32) -> (i32, i32) {
    %c0_i32 = arith.constant 0 : i32
    %c0_i32_0 = arith.constant 0 : i32
    return %c0_i32, %arg1 : i32, i32
  }
  func.func @transform_3(%arg0: i32, %arg1: i32, %arg2: i32) -> (i32, i32) {
    %c0_i32 = arith.constant 0 : i32
    %c0_i32_0 = arith.constant 0 : i32
    return %arg2, %c0_i32 : i32, i32
  }
  func.func @transform_4(%arg0: i32, %arg1: i32, %arg2: i32) -> (i32, i32) {
    %c0_i32 = arith.constant 0 : i32
    %c0_i32_0 = arith.constant 0 : i32
    return %c0_i32, %arg1 : i32, i32
  }
  func.func @transform_5(%arg0: i32, %arg1: i32, %arg2: i32) -> (i32, i32) {
    %c0_i32 = arith.constant 0 : i32
    return %arg0, %arg1 : i32, i32
  }
}

</mosaic_0001>

<bundles_post_ra>
// kernel: tpu_custom_call.1
= control target key start
LH: loop header
LB: loop body
LE: loop exit
PB: predicated region body
PF: predicated region fallthrough
CT: control target
= control target key end

     0   :  { %s2097_s0 = inlined_call_operand.vmem [shape: f32[128,256], index: 0, kind: input, shape index: {}]   ;;  %s2098_s1 = inlined_call_operand.hbm [shape: f32[256,256], index: 1, kind: input, shape index: {}]   ;;  %s2099_s2 = inlined_call_operand.vmem [shape: f32[1,256], index: 2, kind: input, shape index: {}]   ;;  %s2100_s3 = inlined_call_operand.vmem [shape: f32[256,4], index: 3, kind: input, shape index: {}]   ;;  %s2101_s4 = inlined_call_operand.vmem [shape: f32[4,256], index: 4, kind: input, shape index: {}]   ;;  %s2102_s5 = inlined_call_operand.hbm [shape: f32[128,256], index: 5, kind: output, shape index: {}]  }
   0x1   :  { %2114 = sst [smem:[#allocation22_spill]] %s2097_s0 }
   0x2   :  { %2115 = sst [smem:[#allocation23_spill]] %s2098_s1 }
   0x3   :  { %2116 = sst [smem:[#allocation24_spill]] %s2099_s2 }
   0x4   :  { %2117 = sst [smem:[#allocation25_spill]] %s2100_s3 }
   0x5   :  { %2118 = sst [smem:[#allocation26_spill]] %s2101_s4 }
   0x6   :  { %2119 = sst [smem:[#allocation27_spill]] %s2102_s5 }
   0x7   :  { %10 = vsyncpa [#allocation6], 0 }
   0x8   :  { %12 = vsyncpa [#allocation6 + $0x1], 0 }
   0x9   :  { %13 = vsyncpa [#allocation7], 0 }
   0xa   :  { %15 = vsyncpa [#allocation7 + $0x1], 0  ;;  %s1703_s18 = smov 0   ;;  %s1705_s19 = smov 0  }
   0xb   :  { %s1707_s20 = smov 0   ;;  %s1709_s21 = smov 0  }
   0xc   :  { %s1711_s22 = smov 0   ;;  %s1713_s23 = smov 0  }
   0xd   :  { %s1715_s24 = smov 0   ;;  %s1717_s25 = smov 0  }
   0xe   :  { %s1719_s26 = smov 0   ;;  %s1721_s27 = smov 0  }
   0xf   :  { %s1723_s28 = smov 0   ;;  %s1725_s29 = smov 0  }
  0x10   :  { %s1727_s30 = smov 0   ;;  %s1729_s6 = smov 0  }
  0x11   :  { %s1731_s7 = smov 0  }
  0x12 LB: > { %2120 = sst [smem:[#allocation11_spill]] %s1634_s25  ;;  %s33_s10 = sadd.s32 1, %s1650_s29  ;;  %s1662_s7 = sphi %s1731_s7, %s21_s7   ;;  %s1658_s6 = sphi %s1729_s6, %s2161_s6   ;;  %s1654_s30 = sphi %s1727_s30, %s2160_s30   ;;  %s1650_s29 = sphi %s1725_s29, %s2159_s29   ;;  %s1646_s28 = sphi %s1723_s28, %s2158_s28   ;;  %s1642_s27 = sphi %s1721_s27, %s2157_s27   ;;  %s1638_s26 = sphi %s1719_s26, %s2156_s26   ;;  %s1634_s25 = sphi %s1717_s25, %s2155_s25   ;;  %s1630_s24 = sphi %s1715_s24, %s2154_s24   ;;  %s1626_s23 = sphi %s1713_s23, %s2167_s23   ;;  %s1622_s22 = sphi %s1711_s22, %s2166_s22   ;;  %s1618_s21 = sphi %s1709_s21, %s2165_s21   ;;  %s1614_s20 = sphi %s1707_s20, %s2164_s20   ;;  %s1610_s19 = sphi %s1705_s19, %s2163_s19   ;;  %s1606_s18 = sphi %s1703_s18, %s2162_s18  }
  0x13   : > { %2121 = sst [smem:[#allocation12_spill]] %s1638_s26  ;;  %s36_s11 = sadd.s32 1, %s1654_s30 }
  0x14   : > { %2122 = sst [smem:[#allocation13_spill]] %s1646_s28  ;;  %p34_p0 = scmp.ge.s32.totalorder %s33_s10, 2 }
  0x15   : > { %2123 = sst [smem:[#allocation14_spill]] %s1650_s29  ;;  %s40_s12 = sadd.s32 1, %s1658_s6 }
  0x16   : > { %2124 = sst [smem:[#allocation15_spill]] %s1654_s30  ;;  %s49_s13 = sadd.s32 1, %s1634_s25 }
  0x17   : > { %2125 = sst [smem:[#allocation16_spill]] %s1658_s6  ;;  %p56_p1 = scmp.ne.s32.totalorder %s1634_s25, %s1630_s24 }
  0x18   : > { %s2169_s10 = smov (%p34_p0, %s33_s10), 0  ;;  %s2171_s11 = smov (!%p34_p0, %s36_s11), %s1654_s30 }
  0x19   : > { %2126 = sst [smem:[#allocation17_spill]] %s2169_s10  ;;  %s45_s14 = ssub.s32 %s1650_s29, %s2169_s10 }
  0x1a   : > { %p57_p2 = scmp.eq.s32.totalorder %s1662_s7, 0  ;;  %p38_p3 = scmp.ge.s32.totalorder %s2171_s11, 2 }
  0x1b   : > { %s77_s15 = sadd.s32 1, %s1626_s23  ;;  %p84_p5 = scmp.ne.s32.totalorder %s1626_s23, %s1622_s22 }
  0x1c   : > { %p1793_p4 = por %p57_p2, %p56_p1  ;;  %s2173_s11 = smov (%p38_p3, %s2171_s11), 0 }
  0x1d   : > { %2128 = sst [smem:[#allocation18_spill]] %s2173_s11  ;;  %s2175_s12 = smov (!%p38_p3, %s40_s12), %s1658_s6 }
  0x1e   : > { %s72_s17 = ssub.s32 %s1654_s30, %s2173_s11  ;;  %p1804_p6 = por %p84_p5, %p57_p2 }
  0x1f   : > { %p42_p7 = scmp.ge.s32.totalorder %s2175_s12, 2  ;;  %s74_s8 = sor.u32 %s72_s17, %s45_s14 }
  0x20   : > { %p75_p8 = scmp.eq.s32.totalorder %s74_s8, 0  ;;  %p90_p9 = scmp.ne.s32.totalorder %s1622_s22, %s1618_s21 }
  0x21   : > { %s2177_s12 = smov (%p42_p7, %s2175_s12), 0  ;;  %s2132_s5 = sadd.s32 4294967295, %s1662_s7  }
  0x22   : > { %2130 = sst [smem:[#allocation19_spill]] %s2177_s12  ;;  %s44_s10 = ssub.s32 %s1658_s6, %s2177_s12 }
  0x23   : > { %s1813_s11 = scalar_select %p75_p8, %s1626_s23, %s77_s15  }
  0x24   : > { %p91_p10 = scmp.eq.s32.totalorder %s2132_s5, 0  ;;  %s46_s28 = sor.u32 %s45_s14, %s44_s10 }
  0x25   : > { %2131 = sst [smem:[#allocation20_spill]] %s1813_s11  ;;  %s180_s3 = sor.u32 %s72_s17, %s44_s10 }
  0x26   : > { %p47_p11 = scmp.eq.s32.totalorder %s46_s28, 0  ;;  %p1819_p12 = por %p91_p10, %p90_p9 }
  0x27   : > { %p181_p13 = scmp.eq.s32.totalorder %s180_s3, 0  ;;  %s183_s8 = sadd.s32 1, %s1614_s20 }
  0x28   : > { %s1825_s2 = scalar_select %p47_p11, %s1634_s25, %s49_s13  }
  0x29   : > { %s1828_s21 = scalar_select %p181_p13, %s1614_s20, %s183_s8  }
  0x2a   : > { %2134 = sst [smem:[#allocation21_spill]] %s1825_s2  ;;  %p193_p0 = scmp.ne.s32.totalorder %s1614_s20, %s1610_s19 }
  0x2b   : > { %s2135_s26 = smov %s2132_s5  ;;  %p199_p2 = scmp.ne.s32.totalorder %s1610_s19, %s1606_s18 }
  0x2c   : > { %p194_p1 = scmp.eq.s32.totalorder %s2135_s26, 7  ;;  %s2136_s15 = sadd.s32 4294967294, %s1662_s7  }
  0x2d   : > { %p200_p3 = scmp.eq.s32.totalorder %s2136_s15, 7  ;;  %p1082_p8 = scmp.ge.s32.totalorder %s1662_s7, 8 }
  0x2e   : > { %p1838_p5 = por %p194_p1, %p193_p0 }
  0x2f   : > { %p1842_p7 = por %p200_p3, %p199_p2  ;;  %216 = sbr.rel (%p1082_p8) target bundleno = 101 (0x65), region = 16 }
  0x30   : > { %s2137_s5 = scalar_select %p1838_p5, 1, 0 }
  0x31   : > { %s2138_s28 = scalar_select %p1842_p7, 1, 0 }
  0x36   : > { %219 = sbr.rel (!%p1793_p4) target bundleno = 68 (0x44), region = 20  ;;  %s221_s3 = sand.u32 (%p1793_p4), 1, %s1634_s25  }
  0x37   : > { %s1116_s26 = sshll.u32 (%p1793_p4), %s1658_s6, 4  ;;  %s1083_s10 = sshll.u32 (%p1793_p4), %s221_s3, 6 }
  0x38   : > { %s226_s13 = sadd.s32 (%p1793_p4), %s1650_s29, %s1116_s26  ;;  %s2139_s0 = sld [smem:[#allocation22_spill]] (%p1793_p4) }
  0x39   : > { %s1086_s14 = sshll.u32 (%p1793_p4), %s226_s13, 3  ;;  %s223_s12 = scalar_lea.vmem (%p1793_p4), [#allocation4], %s1083_s10 }
  0x3e   : > { %s228_s15 = scalar_lea.vmem %s2139_s0, %s1086_s14 }
  0x3f   : > { %v270_v0 = vld [vmem:[%s228_s15] sm:$0xff]  ;;  %v272_v1 = vld [vmem:[%s228_s15 + $0x10] sm:$0xff] }
  0x40   : > { %v274_v2 = vld [vmem:[%s228_s15 + $0x20] sm:$0xff]  ;;  %271 = vst [vmem:[%s223_s12] sm:$0xff] %v270_v0  ;;  %273 = vst [vmem:[%s223_s12 + $0x8] sm:$0xff] %v272_v1  ;;  %v276_v3 = vld [vmem:[%s228_s15 + $0x30] sm:$0xff] }
  0x41   : > { %275 = vst [vmem:[%s223_s12 + $0x10] sm:$0xff] %v274_v2  ;;  %v278_v4 = vld [vmem:[%s228_s15 + $0x40] sm:$0xff]  ;;  %v280_v5 = vld [vmem:[%s228_s15 + $0x50] sm:$0xff]  ;;  %277 = vst [vmem:[%s223_s12 + $0x18] sm:$0xff] %v276_v3 }
  0x42   : > { %279 = vst [vmem:[%s223_s12 + $0x20] sm:$0xff] %v278_v4  ;;  %281 = vst [vmem:[%s223_s12 + $0x28] sm:$0xff] %v280_v5  ;;  %v282_v6 = vld [vmem:[%s228_s15 + $0x60] sm:$0xff]  ;;  %v284_v7 = vld [vmem:[%s228_s15 + $0x70] sm:$0xff] }
  0x43   : > { %283 = vst [vmem:[%s223_s12 + $0x30] sm:$0xff] %v282_v6  ;;  %285 = vst [vmem:[%s223_s12 + $0x38] sm:$0xff] %v284_v7 }
  0x44 PF: > { %s292_s16 = sand.u32 1, %s1626_s23   ;;  %s1117_s3 = sshll.u32 %s1654_s30, 5 }
  0x45   : > { %s1087_s26 = sshll.u32 %s292_s16, 7  ;;  %s302_s10 = sadd.s32 %s1650_s29, %s1117_s3 }
  0x46   : > { %s1090_s13 = sshll.u32 %s302_s10, 7  ;;  %s296_s14 = scalar_lea.vmem [#allocation5], %s1087_s26 }
  0x47   : > { %s305_s17 = sshll.u32 %s296_s14, 4  ;;  %s2140_s1 = sld [smem:[#allocation23_spill]]  ;;  %s1863_s17 = int_to_ptr.vmem [resolvable:$true] %s305_s17 }
  0x48   : > { %s1865_s12 = scalar_lea.sflag [#allocation6], %s292_s16 }
  0x4d   : > { %s1861_s6 = scalar_lea.hbm %s2140_s1, %s1090_s13  ;;  %s1484_s10 = scalar_lea.hbm %s2140_s1, 8192 }
  0x4e   : > { %s1480_s15 = scalar_lea.hbm %s1861_s6, 2048  ;;  %p1485_p11 = scmp.lt.u32.totalorder %s1861_s6, %s2140_s1 }
  0x4f   : > { %p1481_p4 = scmp.ne.s32.totalorder %s1861_s6, %s1480_s15  ;;  %p1486_p13 = scmp.lt.u32.totalorder %s1484_s10, %s1480_s15 }
  0x50   : > { %p1488_p1 = scmp.lt.u32.totalorder %s1480_s15, %s1861_s6 }
  0x51   : > { %p1482_p9 = pnand %p1481_p4, %p1804_p6  ;;  %p1487_p0 = por %p1486_p13, %p1485_p11 }
  0x53   : > { %p1483_p10 = pneg %p1482_p9  ;;  %p1489_p2 = por %p1488_p1, %p1487_p0 }
  0x55   : > { %p1490_p3 = pnand %p1489_p2, %p1483_p10 }
  0x57   : > { %1493 = shalt.err (!%p1490_p3)
}
  0x58   : > { %s1494_s16 = scalar_lea.vmem %s1863_s17, 2048  ;;  %s1664_s14 = smov [#allocation5]  }
  0x59   : > { %p1495_p8 = scmp.ne.s32.totalorder %s1863_s17, %s1494_s16  ;;  %s1498_s8 = sshll.u32 %s1664_s14, 4  ;;  %s1499_s8 = int_to_ptr.vmem [resolvable:$false] %s1498_s8 }
  0x5a   : > { %s1500_s3 = scalar_lea.vmem %s1499_s8, 4096  ;;  %p1501_p7 = scmp.lt.s32.totalorder %s1863_s17, %s1499_s8 }
  0x5b   : > { %p1496_p4 = pnand %p1495_p8, %p1804_p6  ;;  %p1502_p5 = scmp.lt.s32.totalorder %s1500_s3, %s1494_s16 }
  0x5d   : > { %p1497_p9 = pneg %p1496_p4  ;;  %p1503_p11 = por %p1502_p5, %p1501_p7 }
  0x5f   : > { %p1504_p13 = pnand %p1503_p11, %p1497_p9 }
  0x61   : > { %1507 = shalt.err (!%p1504_p13)
}
  0x62   : > { %s1665_s15 = smov 256   ;;  %s1666_s26 = smov 128  }
  0x63   : > { %s1667_s10 = smov 8  }
  0x64   : > { %1344 = dma.hbm_to_vmem [thread:$0]  (%p1804_p6), %s1861_s6, 2048, %s1863_s17, %s1865_s12, %s1665_s15, %s1666_s26, %s1667_s10  }
  0x65 PF: > { %p1091_p10 = scmp.ge.s32.totalorder %s1662_s7, 1  ;;  %p335_p0 = scmp.lt.s32.totalorder %s1662_s7, 9 }
  0x67   : > { %p336_p1 = pnand %p1091_p10, %p335_p0 }
  0x68   : > { %s342_s0 = sand.u32 (!%p336_p1), 1, %s1630_s24   ;;  %s348_s13 = sand.u32 (!%p336_p1), 1, %s1622_s22  }
  0x69   : > { %339 = sbr.rel (%p336_p1) target bundleno = 661 (0x295), region = 74  ;;  %s1092_s16 = sshll.u32 (!%p336_p1), %s342_s0, 6 }
  0x6a   : > { %s1093_s14 = sshll.u32 (!%p336_p1), %s348_s13, 7  ;;  %s1893_s8 = scalar_lea.vmem (!%p336_p1), [#allocation4], %s1092_s16 }
  0x6b   : > { %s349_s3 = scalar_lea.sflag (!%p336_p1), [#allocation6], %s348_s13  ;;  %s1895_s1 = scalar_lea.vmem (!%p336_p1), [#allocation5], %s1093_s14 }
  0x70   : > { %1597 = dma.done.wait (%p1819_p12), %s349_s3, 2048  }
  0x71   : > { %1599 = vsyncadd (%p1819_p12), %s349_s3, 4294965248  ;;  %s2141_s6 = sld [smem:[#allocation12_spill]]  ;;  %s2112_s9 = sand.u32 1, %s1610_s19  }
  0x72   : > { %p397_p6 = scmp.lt.s32.totalorder %s1642_s27, 1  ;;  %s1094_s24 = sshll.u32 %s2112_s9, 6 }
  0x73   : > { %s2142_s4 = sld [smem:[#allocation24_spill]]  ;;  %s2143_s3 = sld [smem:[#allocation26_spill]] }
  0x74   : > { %s1907_s12 = scalar_select %p397_p6, %s1642_s27, 1 }
  0x75   : > { %s2144_s2 = sld [smem:[#allocation25_spill]]  ;;  %s1924_s11 = scalar_lea.vmem [#allocation8], %s1094_s24 }
  0x76   : > { %s1097_s0 = sshll.u32 %s1907_s12, 2 }
  0x77   : > { %s1095_s17 = sshll.u32 %s2141_s6, 4  ;;  %p1098_p12 = scmp.ne.s32.totalorder %s2141_s6, 0 }
  0x78   : > { %p401_p5 = scmp.lt.s32.totalorder %s1095_s17, 31  ;;  %vm423_vm0 = vcmask (!%p1098_p12), 31744   ;;  %v1668_v8 = vmov (!%p1098_p12), 0.0  }
  0x79   : > { %s399_s10 = scalar_lea.vmem %s2142_s4, %s1907_s12  ;;  %s1917_s30 = scalar_lea.vmem %s2143_s3, %s1097_s0  ;;  %415 = vst [vmem:[#allocation2] sm:$0xff] (!%p1098_p12), %v1668_v8  ;;  %416 = vst [vmem:[#allocation2 + $0x8] sm:$0xff] (!%p1098_p12), %v1668_v8 }
  0x7a   : > { %s2179_s17 = smov (!%p401_p5, %s1095_s17), 31  ;;  %414 = sbr.rel (%p1098_p12) target bundleno = 130 (0x82), region = 86 }
  0x7b   : > { %s1096_s13 = sshll.u32 %s2179_s17, 3  ;;  %417 = vst [vmem:[#allocation2 + $0x10] sm:$0xff] (!%p1098_p12), %v1668_v8  ;;  %418 = vst [vmem:[#allocation2 + $0x18] sm:$0xff] (!%p1098_p12), %v1668_v8 }
  0x7c   : > { %s1922_s25 = scalar_lea.vmem %s2144_s2, %s1096_s13  ;;  %419 = vst [vmem:[#allocation2 + $0x20] sm:$0xff] (!%p1098_p12), %v1668_v8  ;;  %420 = vst [vmem:[#allocation2 + $0x28] sm:$0xff] (!%p1098_p12), %v1668_v8 }
  0x7d   : > { %421 = vst [vmem:[#allocation2 + $0x30] sm:$0xff] (!%p1098_p12), %v1668_v8  ;;  %422 = vst [vmem:[#allocation2 + $0x38] sm:$0xff] (!%p1098_p12), %v1668_v8 }
  0x7e   : > { %424 = vst.msk [vmem:[#allocation3] sm:$0xff] (!%p1098_p12), %vm423_vm0, %v1668_v8  ;;  %425 = vst.msk [vmem:[#allocation3 + $0x8] sm:$0xff] (!%p1098_p12), %vm423_vm0, %v1668_v8 }
  0x7f   : > { %426 = vst.msk [vmem:[#allocation3 + $0x10] sm:$0xff] (!%p1098_p12), %vm423_vm0, %v1668_v8  ;;  %427 = vst.msk [vmem:[#allocation3 + $0x18] sm:$0xff] (!%p1098_p12), %vm423_vm0, %v1668_v8 }
  0x80   : > { %428 = vst.msk [vmem:[#allocation3 + $0x20] sm:$0xff] (!%p1098_p12), %vm423_vm0, %v1668_v8  ;;  %429 = vst.msk [vmem:[#allocation3 + $0x28] sm:$0xff] (!%p1098_p12), %vm423_vm0, %v1668_v8 }
  0x81   : > { %430 = vst.msk [vmem:[#allocation3 + $0x30] sm:$0xff] %vm423_vm0, %v1668_v8  ;;  %431 = vst.msk [vmem:[#allocation3 + $0x38] sm:$0xff] %vm423_vm0, %v1668_v8 }
  0x82 PF: > { %v448_v9 = vld [vmem:[%s1895_s1] sm:$0xff]  ;;  %v449_v10 = vld [vmem:[%s1895_s1 + $0x8] sm:$0xff]  ;;  %v450_v11 = vld [vmem:[%s1895_s1 + $0x10] sm:$0xff]  ;;  %vm722_vm1 = vcmask 31744  }
  0x83   : > { %v1278_v12 = vpack.c.bf16 %v449_v10, %v448_v9  ;;  %v451_v13 = vld [vmem:[%s1895_s1 + $0x18] sm:$0xff]  ;;  %v593_v15 = vld [vmem:[%s1922_s25] sm:$0xff]  ;;  %v594_v16 = vld [vmem:[%s1922_s25 + $0x8] sm:$0xff] }
  0x84   : > { %v1282_v14 = vpack.c.bf16 %v451_v13, %v450_v11  ;;  %v1310_v17 = vpack.c.bf16 %v594_v16, %v593_v15  ;;  %v595_v18 = vld [vmem:[%s1922_s25 + $0x10] sm:$0xff]  ;;  %v596_v19 = vld [vmem:[%s1922_s25 + $0x18] sm:$0xff]  ;;  %v597_v21 = vld [vmem:[%s1922_s25 + $0x20] sm:$0xff] }
  0x85   : > { %1279 = vmatprep.subr.bf16.mxu0 %v1278_v12  ;;  %v1314_v20 = vpack.c.bf16 %v596_v19, %v595_v18  ;;  %v598_v22 = vld [vmem:[%s1922_s25 + $0x28] sm:$0xff]  ;;  %v452_v23 = vld [vmem:[%s1895_s1 + $0x20] sm:$0xff]  ;;  %v599_v27 = vld [vmem:[%s1922_s25 + $0x30] sm:$0xff] }
  0x86   : > { %1281 = vmatpush3.bf16.xpose.msra.mxu0 %v1278_v12  ;;  %v453_v24 = vld [vmem:[%s1895_s1 + $0x28] sm:$0xff]  ;;  %1311 = vmatprep.subr.bf16.mxu1 %v1310_v17  ;;  %v1318_v25 = vpack.c.bf16 %v598_v22, %v597_v21  ;;  %v600_v28 = vld [vmem:[%s1922_s25 + $0x38] sm:$0xff]  ;;  %v432_v29 = vld [vmem:[%s1893_s8] sm:$0xff] }
  0x87   : > { %1283 = vmatprep.subr.bf16.mxu0 %v1282_v14  ;;  %1313 = vmatpush3.bf16.msra.mxu1 %v1310_v17  ;;  %v1286_v26 = vpack.c.bf16 %v453_v24, %v452_v23  ;;  %v1322_v30 = vpack.c.bf16 %v600_v28, %v599_v27  ;;  %v601_v31 = vld [vmem:[%s1922_s25 + $0x40] sm:$0xff]  ;;  %v602_v32 = vld [vmem:[%s1922_s25 + $0x48] sm:$0xff]  ;;  %v454_v33 = vld [vmem:[%s1895_s1 + $0x30] sm:$0xff] }
  0x88   : > { %1315 = vmatprep.subr.bf16.mxu1 %v1314_v20  ;;  %1252 = vmatprep.mubr.f32.mxu1 %v432_v29  ;;  %v455_v34 = vld [vmem:[%s1895_s1 + $0x38] sm:$0xff]  ;;  %v1326_v35 = vpack.c.bf16 %v602_v32, %v601_v31  ;;  %v603_v37 = vld [vmem:[%s1922_s25 + $0x50] sm:$0xff]  ;;  %v605_v40 = vld [vmem:[%s1922_s25 + $0x60] sm:$0xff] }
  0x89   : > { %1208 = vmatprep.mubr.f32.mxu0 %v432_v29  ;;  %v1290_v36 = vpack.c.bf16 %v455_v34, %v454_v33  ;;  %v604_v38 = vld [vmem:[%s1922_s25 + $0x58] sm:$0xff]  ;;  %v606_v41 = vld [vmem:[%s1922_s25 + $0x68] sm:$0xff]  ;;  %v456_v42 = vld [vmem:[%s1895_s1 + $0x40] sm:$0xff] }
  0x8a   : > { %v1330_v39 = vpack.c.bf16 %v604_v38, %v603_v37  ;;  %v457_v43 = vld [vmem:[%s1895_s1 + $0x48] sm:$0xff]  ;;  %v1334_v44 = vpack.c.bf16 %v606_v41, %v605_v40  ;;  %v607_v46 = vld [vmem:[%s1922_s25 + $0x70] sm:$0xff]  ;;  %v608_v47 = vld [vmem:[%s1922_s25 + $0x78] sm:$0xff] }
  0x8b   : > { %1317 = vmatpush3.bf16.msra.mxu1 %v1314_v20  ;;  %v1294_v45 = vpack.c.bf16 %v457_v43, %v456_v42  ;;  %v1338_v48 = vpack.c.bf16 %v608_v47, %v607_v46  ;;  %v458_v49 = vld [vmem:[%s1895_s1 + $0x50] sm:$0xff]  ;;  %v459_v50 = vld [vmem:[%s1895_s1 + $0x58] sm:$0xff]  ;;  %v433_v52 = vld [vmem:[%s1893_s8 + $0x8] sm:$0xff] }
  0x8c   : > { %1319 = vmatprep.subr.bf16.mxu1 %v1318_v25  ;;  %v1298_v51 = vpack.c.bf16 %v459_v50, %v458_v49  ;;  %v434_v53 = vld [vmem:[%s1893_s8 + $0x10] sm:$0xff]  ;;  %v460_v54 = vld [vmem:[%s1895_s1 + $0x60] sm:$0xff]  ;;  %v461_v55 = vld [vmem:[%s1895_s1 + $0x68] sm:$0xff] }
  0x8d   : > { %v435_v56 = vld [vmem:[%s1893_s8 + $0x18] sm:$0xff]  ;;  %v436_v57 = vld [vmem:[%s1893_s8 + $0x20] sm:$0xff]  ;;  %v1302_v58 = vpack.c.bf16 %v461_v55, %v460_v54  ;;  %v437_v59 = vld [vmem:[%s1893_s8 + $0x28] sm:$0xff] }
  0x8e   : > { %1285 = vmatpush3.bf16.xpose.msra.mxu0 %v1282_v14  ;;  %v438_v60 = vld [vmem:[%s1893_s8 + $0x30] sm:$0xff]  ;;  %v463_v62 = vld [vmem:[%s1895_s1 + $0x78] sm:$0xff]  ;;  %v586_v1 = vld [vmem:[#allocation3 + $0x8] sm:$0xff] }
  0x8f   : > { %1287 = vmatprep.subr.bf16.mxu0 %v1286_v26  ;;  %1321 = vmatpush3.bf16.msra.mxu1 %v1318_v25  ;;  %v462_v61 = vld [vmem:[%s1895_s1 + $0x70] sm:$0xff]  ;;  %v439_v63 = vld [vmem:[%s1893_s8 + $0x38] sm:$0xff]  ;;  %v585_v2 = vld [vmem:[#allocation3] sm:$0xff]  ;;  %s2145_s1 = sld [smem:[#allocation12_spill]] }
  0x90   : > { %1323 = vmatprep.subr.bf16.mxu1 %v1322_v30  ;;  %v1306_v0 = vpack.c.bf16 %v463_v62, %v462_v61  ;;  %v588_v7 = vld [vmem:[#allocation3 + $0x18] sm:$0xff]  ;;  %v587_v8 = vld [vmem:[#allocation3 + $0x10] sm:$0xff]  ;;  %v590_v13 = vld [vmem:[#allocation3 + $0x28] sm:$0xff] }
  0x91   : > { %v589_v14 = vld [vmem:[#allocation3 + $0x20] sm:$0xff]  ;;  %v592_v19 = vld [vmem:[#allocation3 + $0x38] sm:$0xff]  ;;  %v591_v20 = vld [vmem:[#allocation3 + $0x30] sm:$0xff] }
  0x92   : > { %v441_v25 = vld [vmem:[#allocation2 + $0x8] sm:$0xff]  ;;  %v443_v31 = vld [vmem:[#allocation2 + $0x18] sm:$0xff]  ;;  %v442_v32 = vld [vmem:[#allocation2 + $0x10] sm:$0xff] }
  0x93   : > { %1325 = vmatpush3.bf16.msra.mxu1 %v1322_v30  ;;  %v445_v37 = vld [vmem:[#allocation2 + $0x28] sm:$0xff]  ;;  %v444_v38 = vld [vmem:[#allocation2 + $0x20] sm:$0xff]  ;;  %v447_v43 = vld [vmem:[#allocation2 + $0x38] sm:$0xff] }
  0x94   : > { %1327 = vmatprep.subr.bf16.mxu1 %v1326_v35 }
  0x95   : > { %p1099_p7 = scmp.ne.s32.totalorder %s2145_s1, 1 }
  0x96   : > { %1289 = vmatpush3.bf16.xpose.msra.mxu0 %v1286_v26  ;;  %v440_v26 = vld [vmem:[#allocation2] sm:$0xff]  ;;  %vm791_vm2 = vcmask (!%p1099_p7), 1043456  }
  0x97   : > { %1291 = vmatprep.subr.bf16.mxu0 %v1290_v36  ;;  %1329 = vmatpush3.bf16.msra.mxu1 %v1326_v35  ;;  %v766_v49 = vld [vmem:[%s1917_s30] sm:$0xf] (!%p1099_p7) }
  0x98   : > { %1331 = vmatprep.subr.bf16.mxu1 %v1330_v39 }
  0x9b   : > { %1333 = vmatpush3.bf16.msra.mxu1 %v1330_v39 }
  0x9c   : > { %1335 = vmatprep.subr.bf16.mxu1 %v1334_v44 }
  0x9e   : > { %1293 = vmatpush3.bf16.xpose.msra.mxu0 %v1290_v36 }
  0x9f   : > { %1295 = vmatprep.subr.bf16.mxu0 %v1294_v45  ;;  %1337 = vmatpush3.bf16.msra.mxu1 %v1334_v44  ;;  %v446_v44 = vld [vmem:[#allocation2 + $0x30] sm:$0xff] }
  0xa0   : > { %1339 = vmatprep.subr.bf16.mxu1 %v1338_v48 }
  0xa3   : > { %1341 = vmatpush3.bf16.msra.mxu1 %v1338_v48 }
  0xa4   : > { %1342 = vmatprep.subr.msk.mxu1 (!%p1099_p7), %vm791_vm2, %v766_v49 }
  0xa6   : > { %1297 = vmatpush3.bf16.xpose.msra.mxu0 %v1294_v45  ;;  %1253 = vmatmul.mubr.f32.vlgmr.msra.gmra.mrb[0].mxu1 %v433_v52 }
  0xa7   : > { %1299 = vmatprep.subr.bf16.mxu0 %v1298_v51  ;;  %1255 = vmatprep.mubr.f32.mxu1 %v434_v53 }
  0xa8   : > { %1343 = vmatpush3.msk.msra.mxu1 (!%p1099_p7), %vm791_vm2, %v766_v49 }
  0xaa   : > { %1256 = vmatmul.mubr.f32.gmra.mrb[2].mxu1 %v435_v56 }
  0xab   : > { %1258 = vmatprep.mubr.f32.mxu1 %v436_v57 }
  0xae   : > { %1301 = vmatpush3.bf16.xpose.msra.mxu0 %v1298_v51  ;;  %1259 = vmatmul.mubr.f32.gmra.mrb[4].mxu1 %v437_v59 }
  0xaf   : > { %1303 = vmatprep.subr.bf16.mxu0 %v1302_v58  ;;  %1261 = vmatprep.mubr.f32.mxu1 %v438_v60 }
  0xb2   : > { %1262 = vmatmul.mubr.f32.gmra.mrb[6].mxu1 %v439_v63 }
  0xb6   : > { %1305 = vmatpush3.bf16.xpose.msra.mxu0 %v1302_v58 }
  0xb7   : > { %1307 = vmatprep.subr.bf16.mxu0 %v1306_v0 }
  0xbe   : > { %1309 = vmatpush3.bf16.xpose.msra.mxu0 %v1306_v0 }
  0xbf   : > { %1264 = vmatprep.subr.msk.mxu0 (!%p1099_p7), %vm791_vm2, %v766_v49 }
  0xc5   : > { %1209 = vmatmul.mubr.f32.vlgmr.msra.gmra.mrb[0].mxu0 %v433_v52 }
  0xc6   : > { %1211 = vmatprep.mubr.f32.mxu0 %v434_v53  ;;  %1265 = vmatpush3.msk.msra.mxu0 (!%p1099_p7), %vm791_vm2, %v766_v49 }
  0xc9   : > { %1212 = vmatmul.mubr.f32.gmra.mrb[2].mxu0 %v435_v56 }
  0xca   : > { %1214 = vmatprep.mubr.f32.mxu0 %v436_v57 }
  0xcd   : > { %1215 = vmatmul.mubr.f32.gmra.mrb[4].mxu0 %v437_v59  ;;  %v1100_v59 = vld [vmem:[%s399_s10] ss:$0 sm:$0xff] (!%p1099_p7) }
  0xce   : > { %1217 = vmatprep.mubr.f32.mxu0 %v438_v60 }
  0xd1   : > { %1218 = vmatmul.mubr.f32.gmra.mrb[6].mxu0 %v439_v63 }
 0x179   : > { %v1254_v3 = vpop.f32.mrb[0].mxu1 }
 0x17a   : > { %v715_v4 = vadd.f32 %v1254_v3, %v586_v1  ;;  %v675_v5 = vpop.f32.mrb[1].mxu1 }
 0x17b   : > { %v714_v6 = vadd.f32 %v675_v5, %v585_v2 }
 0x17c   : > { %724 = vst.msk [vmem:[#allocation3 + $0x8] sm:$0xff] %vm722_vm1, %v715_v4 }
 0x17d   : > { %723 = vst.msk [vmem:[#allocation3] sm:$0xff] %vm722_vm1, %v714_v6  ;;  %v1257_v9 = vpop.f32.mrb[2].mxu1 }
 0x17e   : > { %v717_v10 = vadd.f32 %v1257_v9, %v588_v7  ;;  %v685_v11 = vpop.f32.mrb[3].mxu1 }
 0x17f   : > { %v716_v12 = vadd.f32 %v685_v11, %v587_v8 }
 0x180   : > { %726 = vst.msk [vmem:[#allocation3 + $0x18] sm:$0xff] %vm722_vm1, %v717_v10 }
 0x181   : > { %725 = vst.msk [vmem:[#allocation3 + $0x10] sm:$0xff] %vm722_vm1, %v716_v12  ;;  %v1260_v15 = vpop.f32.mrb[4].mxu1 }
 0x182   : > { %v719_v16 = vadd.f32 %v1260_v15, %v590_v13  ;;  %v695_v17 = vpop.f32.mrb[5].mxu1 }
 0x183   : > { %v718_v18 = vadd.f32 %v695_v17, %v589_v14  ;;  %v759_v52 = vld [vmem:[#allocation3 + $0x8] sm:$0xff] (!%p1099_p7) }
 0x184   : > { %728 = vst.msk [vmem:[#allocation3 + $0x28] sm:$0xff] %vm722_vm1, %v719_v16  ;;  %v758_v50 = vld [vmem:[#allocation3] sm:$0xff] (!%p1099_p7) }
 0x185   : > { %727 = vst.msk [vmem:[#allocation3 + $0x20] sm:$0xff] %vm722_vm1, %v718_v18  ;;  %v1263_v21 = vpop.f32.mrb[6].mxu1  ;;  %1266 = vmatprep.mubr.msk.f32.mxu0 (!%p1099_p7), %vm722_vm1, %v758_v50 }
 0x186   : > { %v721_v22 = vadd.f32 %v1263_v21, %v592_v19  ;;  %v705_v23 = vpop.f32.mrb[7].mxu1 }
 0x187   : > { %v720_v24 = vadd.f32 %v705_v23, %v591_v20  ;;  %v761_v56 = vld [vmem:[#allocation3 + $0x18] sm:$0xff] (!%p1099_p7) }
 0x188   : > { %730 = vst.msk [vmem:[#allocation3 + $0x38] sm:$0xff] %vm722_vm1, %v721_v22  ;;  %v760_v54 = vld [vmem:[#allocation3 + $0x10] sm:$0xff] (!%p1099_p7) }
 0x189   : > { %729 = vst.msk [vmem:[#allocation3 + $0x30] sm:$0xff] %vm722_vm1, %v720_v24 }
 0x18b   : > { %v763_v53 = vld [vmem:[#allocation3 + $0x28] sm:$0xff] (!%p1099_p7) }
 0x18c   : > { %v762_v51 = vld [vmem:[#allocation3 + $0x20] sm:$0xff] (!%p1099_p7) }
 0x18d   : > { %1272 = vmatprep.mubr.msk.f32.mxu1 (!%p1099_p7), %vm722_vm1, %v762_v51 }
 0x18e   : > { %1273 = vmatmul.mubr.msk.f32.vlgmr.msra.gmra.mrb[0].mxu1 (!%p1099_p7), %vm722_vm1, %v763_v53 }
 0x18f   : > { %v765_v57 = vld [vmem:[#allocation3 + $0x38] sm:$0xff] (!%p1099_p7) }
 0x190   : > { %v764_v55 = vld [vmem:[#allocation3 + $0x30] sm:$0xff] (!%p1099_p7) }
 0x191   : > { %1275 = vmatprep.mubr.msk.f32.mxu1 (!%p1099_p7), %vm722_vm1, %v764_v55 }
 0x192   : > { %1276 = vmatmul.mubr.msk.f32.gmra.mrb[2].mxu1 (!%p1099_p7), %vm722_vm1, %v765_v57 }
 0x198   : > { %v1210_v27 = vpop.f32.mrb[0].mxu0 }
 0x199   : > { %v570_v28 = vadd.f32 %v1210_v27, %v441_v25  ;;  %v530_v29 = vpop.f32.mrb[1].mxu0  ;;  %1267 = vmatmul.mubr.msk.f32.vlgmr.msra.gmra.mrb[0].mxu0 (!%p1099_p7), %vm722_vm1, %v759_v52 }
 0x19a   : > { %v569_v30 = vadd.f32 %v530_v29, %v440_v26  ;;  %1269 = vmatprep.mubr.msk.f32.mxu0 (!%p1099_p7), %vm722_vm1, %v760_v54 }
 0x19b   : > { %578 = vst [vmem:[#allocation2 + $0x8] sm:$0xff] %v570_v28 }
 0x19c   : > { %577 = vst [vmem:[#allocation2] sm:$0xff] %v569_v30  ;;  %v1213_v33 = vpop.f32.mrb[2].mxu0 }
 0x19d   : > { %v572_v34 = vadd.f32 %v1213_v33, %v443_v31  ;;  %v540_v35 = vpop.f32.mrb[3].mxu0  ;;  %1270 = vmatmul.mubr.msk.f32.gmra.mrb[2].mxu0 (!%p1099_p7), %vm722_vm1, %v761_v56 }
 0x19e   : > { %v571_v36 = vadd.f32 %v540_v35, %v442_v32 }
 0x19f   : > { %580 = vst [vmem:[#allocation2 + $0x18] sm:$0xff] %v572_v34 }
 0x1a0   : > { %579 = vst [vmem:[#allocation2 + $0x10] sm:$0xff] %v571_v36  ;;  %v1216_v39 = vpop.f32.mrb[4].mxu0 }
 0x1a1   : > { %v574_v40 = vadd.f32 %v1216_v39, %v445_v37  ;;  %v550_v41 = vpop.f32.mrb[5].mxu0 }
 0x1a2   : > { %v573_v42 = vadd.f32 %v550_v41, %v444_v38  ;;  %734 = sbr.rel (%p1099_p7) target bundleno = 629 (0x275), region = 90  ;;  %v736_v58 = vld [vmem:[#allocation2 + $0x8] sm:$0xff] (!%p1099_p7) }
 0x1a3   : > { %582 = vst [vmem:[#allocation2 + $0x28] sm:$0xff] %v574_v40  ;;  %v735_v61 = vld [vmem:[#allocation2] sm:$0xff] (!%p1099_p7)  ;;  %v751_v63 = vadd.f32 (!%p1099_p7), %v1100_v59, %v736_v58 }
 0x1a4   : > { %581 = vst [vmem:[#allocation2 + $0x20] sm:$0xff] %v573_v42  ;;  %v1219_v45 = vpop.f32.mrb[6].mxu0  ;;  %v750_v1 = vadd.f32 (!%p1099_p7), %v1100_v59, %v735_v61 }
 0x1a5   : > { %v576_v46 = vadd.f32 %v1219_v45, %v447_v43  ;;  %v560_v47 = vpop.f32.mrb[7].mxu0 }
 0x1a6   : > { %v575_v48 = vadd.f32 %v560_v47, %v446_v44  ;;  %v738_v3 = vld [vmem:[#allocation2 + $0x18] sm:$0xff] (!%p1099_p7) }
 0x1a7   : > { %584 = vst [vmem:[#allocation2 + $0x38] sm:$0xff] %v576_v46  ;;  %v737_v5 = vld [vmem:[#allocation2 + $0x10] sm:$0xff] (!%p1099_p7)  ;;  %v753_v13 = vadd.f32 (!%p1099_p7), %v1100_v59, %v738_v3 }
 0x1a8   : > { %583 = vst [vmem:[#allocation2 + $0x30] sm:$0xff] %v575_v48  ;;  %v752_v17 = vadd.f32 (!%p1099_p7), %v1100_v59, %v737_v5 }
 0x1aa   : > { %v740_v60 = vld [vmem:[#allocation2 + $0x28] sm:$0xff] }
 0x1ab   : > { %v739_v62 = vld [vmem:[#allocation2 + $0x20] sm:$0xff]  ;;  %v755_v0 = vadd.f32 %v1100_v59, %v740_v60 }
 0x1ac   : > { %v754_v2 = vadd.f32 %v1100_v59, %v739_v62 }
 0x1ae   : > { %v742_v4 = vld [vmem:[#allocation2 + $0x38] sm:$0xff] }
 0x1af   : > { %v741_v6 = vld [vmem:[#allocation2 + $0x30] sm:$0xff]  ;;  %v757_v14 = vadd.f32 %v1100_v59, %v742_v4 }
 0x1b0   : > { %v756_v18 = vadd.f32 %v1100_v59, %v741_v6 }
 0x261   : > { %v1274_v8 = vpop.f32.mrb[0].mxu1 }
 0x262   : > { %v905_v10 = vadd.f32 %v1274_v8, %v755_v0  ;;  %v881_v12 = vpop.f32.mrb[1].mxu1 }
 0x263   : > { %v904_v16 = vadd.f32 %v881_v12, %v754_v2 }
 0x264   : > { %913 = vst [vmem:[%s1924_s11 + $0x28] sm:$0xff] %v905_v10 }
 0x265   : > { %912 = vst [vmem:[%s1924_s11 + $0x20] sm:$0xff] %v904_v16  ;;  %v1277_v20 = vpop.f32.mrb[2].mxu1 }
 0x266   : > { %v907_v22 = vadd.f32 %v1277_v20, %v757_v14  ;;  %v891_v24 = vpop.f32.mrb[3].mxu1 }
 0x267   : > { %v906_v26 = vadd.f32 %v891_v24, %v756_v18 }
 0x268   : > { %915 = vst [vmem:[%s1924_s11 + $0x38] sm:$0xff] %v907_v22 }
 0x269   : > { %914 = vst [vmem:[%s1924_s11 + $0x30] sm:$0xff] %v906_v26 }
 0x26c   : > { %v1268_v7 = vpop.f32.mrb[0].mxu0 }
 0x26d   : > { %v901_v9 = vadd.f32 %v1268_v7, %v751_v63  ;;  %v861_v11 = vpop.f32.mrb[1].mxu0 }
 0x26e   : > { %v900_v15 = vadd.f32 %v861_v11, %v750_v1 }
 0x26f   : > { %909 = vst [vmem:[%s1924_s11 + $0x8] sm:$0xff] %v901_v9 }
 0x270   : > { %908 = vst [vmem:[%s1924_s11] sm:$0xff] %v900_v15  ;;  %v1271_v19 = vpop.f32.mrb[2].mxu0 }
 0x271   : > { %v903_v21 = vadd.f32 %v1271_v19, %v753_v13  ;;  %v871_v23 = vpop.f32.mrb[3].mxu0 }
 0x272   : > { %v902_v25 = vadd.f32 %v871_v23, %v752_v17 }
 0x273   : > { %911 = vst [vmem:[%s1924_s11 + $0x18] sm:$0xff] %v903_v21 }
 0x274   : > { %910 = vst [vmem:[%s1924_s11 + $0x10] sm:$0xff] %v902_v25 }
 0x275 PF: > { %s2147_s30 = sld [smem:[#allocation13_spill]]  ;;  %s932_s9 = sshll.u32 %s1924_s11, 4  ;;  %s2009_s9 = int_to_ptr.vmem [resolvable:$true] %s932_s9 }
 0x276   : > { %s2148_s15 = sld [smem:[#allocation27_spill]]  ;;  %s2149_s4 = sand.u32 1, %s1610_s19  }
 0x277   : > { %s2018_s10 = scalar_lea.sflag [#allocation7], %s2149_s4  ;;  %s1508_s0 = scalar_lea.vmem %s2009_s9, 1024 }
 0x278   : > { %p1509_p2 = scmp.ne.s32.totalorder %s2009_s9, %s1508_s0  ;;  %p2150_p3 = scmp.ne.s32.totalorder %s2137_s5, 0 }
 0x27a   : > { %p1510_p8 = pnand %p1509_p2, %p2150_p3 }
 0x27b   : > { %s1118_s8 = sshll.u32 %s2147_s30, 4 }
 0x27c   : > { %s929_s6 = sadd.s32 %s1642_s27, %s1118_s8  ;;  %p1511_p4 = pneg %p1510_p8 }
 0x27d   : > { %s1113_s24 = sshll.u32 %s929_s6, 7  ;;  %s1669_s27 = smov [#allocation8]  }
 0x27e   : > { %s2014_s26 = scalar_lea.hbm %s2148_s15, %s1113_s24  ;;  %s1512_s11 = sshll.u32 %s1669_s27, 4  ;;  %s1513_s11 = int_to_ptr.vmem [resolvable:$false] %s1512_s11 }
 0x27f   : > { %s1514_s13 = scalar_lea.vmem %s1513_s11, 2048  ;;  %p1515_p9 = scmp.lt.s32.totalorder %s2009_s9, %s1513_s11 }
 0x280   : > { %p1516_p11 = scmp.lt.s32.totalorder %s1514_s13, %s1508_s0 }
 0x282   : > { %p1517_p13 = por %p1516_p11, %p1515_p9 }
 0x284   : > { %p1518_p10 = pnand %p1517_p13, %p1511_p4 }
 0x286   : > { %1521 = shalt.err (!%p1518_p10)
}
 0x287   : > { %s1522_s16 = scalar_lea.hbm %s2014_s26, 1024  ;;  %s1526_s1 = scalar_lea.hbm %s2148_s15, 4096 }
 0x288   : > { %p1523_p0 = scmp.ne.s32.totalorder %s2014_s26, %s1522_s16  ;;  %p1527_p5 = scmp.lt.u32.totalorder %s2014_s26, %s2148_s15 }
 0x289   : > { %p1528_p12 = scmp.lt.u32.totalorder %s1526_s1, %s1522_s16  ;;  %p1530_p2 = scmp.lt.u32.totalorder %s1522_s16, %s2014_s26 }
 0x28a   : > { %p1524_p1 = pnand %p1523_p0, %p2150_p3 }
 0x28b   : > { %p1529_p7 = por %p1528_p12, %p1527_p5 }
 0x28c   : > { %p1525_p6 = pneg %p1524_p1 }
 0x28d   : > { %p1531_p8 = por %p1530_p2, %p1529_p7 }
 0x28f   : > { %p1532_p4 = pnand %p1531_p8, %p1525_p6 }
 0x291   : > { %1535 = shalt.err (!%p1532_p4)
}
 0x292   : > { %s1670_s29 = smov 128   ;;  %s1671_s30 = smov 256  }
 0x293   : > { %s1672_s8 = smov 8  }
 0x294   : > { %1346 = dma.vmem_to_hbm [thread:$0]  (%p2150_p3), %s2009_s9, 1024, %s2014_s26, %s2018_s10, %s1670_s29, %s1671_s30, %s1672_s8  }
 0x295 PF: > { %p1352_p9 = scmp.ge.s32.totalorder %s1662_s7, 2  ;;  %s947_s6 = sand.u32 1, %s1606_s18  }
 0x296   : > { %p2151_p11 = scmp.ne.s32.totalorder %s2138_s28, 0  ;;  %s948_s24 = scalar_lea.sflag [#allocation7], %s947_s6 }
 0x298   : > { %p1349_p13 = pnand %p1352_p9, %p2151_p11 }
 0x29a   : > { %1601 = dma.done.wait (!%p1349_p13), %s948_s24, 1024  }
 0x29b   : > { %1603 = vsyncadd (!%p1349_p13), %s948_s24, 4294966272  ;;  %s21_s7 = sadd.s32 1, %s1662_s7   ;;  %s2153_s5 = sld [smem:[#allocation20_spill]] }
 0x29c   : > { %p2047_p10 = scmp.ge.s32.totalorder %s21_s7, 10   ;;  %s2154_s24 = sld [smem:[#allocation11_spill]] }
 0x29d   : > { %s2155_s25 = sld [smem:[#allocation21_spill]]  ;;  %s2156_s26 = sld [smem:[#allocation14_spill]] }
 0x29e   : > { %s2157_s27 = sld [smem:[#allocation15_spill]]  ;;  %s2158_s28 = sld [smem:[#allocation16_spill]] }
 0x29f   : > { %s2159_s29 = sld [smem:[#allocation17_spill]]  ;;  %s2160_s30 = sld [smem:[#allocation18_spill]] }
 0x2a0   : > { %s2161_s6 = sld [smem:[#allocation19_spill]]  ;;  %s2162_s18 = smov %s1610_s19 }
 0x2a1   : > { %s2163_s19 = smov %s1614_s20  ;;  %s2164_s20 = smov %s1828_s21 }
 0x2a2   : > { %s2165_s21 = smov %s1622_s22  ;;  %s2166_s22 = smov %s1626_s23 }
 0x2a3   : > { %s2167_s23 = smov %s2153_s5  ;;  %20 = sbr.rel (!%p2047_p10) target bundleno = 18 (0x12), region = 148 }
 0x2aa   :  { %953 = vsyncpa [#allocation6], 1 }
 0x2ab   :  { %955 = vsyncpa [#allocation6 + $0x1], 1 }
 0x2ac   :  { %956 = vsyncpa [#allocation7], 1 }
 0x2ad   :  { %958 = vsyncpa [#allocation7 + $0x1], 1 }

</bundles_post_ra>
